<compile_context>
chip_gen: v5e
topology: v5e:2x2
jax: 0.10.0
libtpu: 0.0.40
codegen_flags: <defaults>
</compile_context>

<pallas_src>
import jax
import jax.numpy as jnp
from jax.experimental import pallas as pl
from jax.experimental.pallas import tpu as pltpu


def _round_up(n: int, m: int) -> int:
    return (n + m - 1) // m * m


def _cdiv(a: int, b: int) -> int:
    return (a + b - 1) // b


def _vmem_capacity_bytes() -> int:
    """Physical VMEM per TensorCore; 64 MiB fallback is safe on every gen."""
    try:
        info = pltpu.get_tpu_info()
        for attr in ("vmem_capacity_bytes", "vmem_bytes", "vmem_size_bytes"):
            v = getattr(info, attr, None)
            if v:
                return int(v)
    except Exception:
        pass
    return 64 * 1024 * 1024


# ----------------------------------------------------------------------------
# Kernels.  Grid = (row tiles [parallel], hidden tiles [arbitrary/reduction]).
# ----------------------------------------------------------------------------
def _gated_mlp_kernel_inplace(x_ref, w12_ref, b12_ref, w3_ref, b3_ref, o_ref):
    """f32 output: accumulate directly into the resident output block."""
    j = pl.program_id(1)
    th = w3_ref.shape[0]  # hidden tile size (static)

    x = x_ref[...]
    # Fused up-projection: one MXU pass yields [gate | value] for this tile.
    h12 = jnp.dot(x, w12_ref[...], preferred_element_type=jnp.float32) + b12_ref[...]
    gate_pre = h12[:, :th]
    value = h12[:, th:]
    gate = gate_pre * jax.nn.sigmoid(gate_pre)          # SiLU in f32 (EUP path)
    h = (gate * value).astype(w3_ref.dtype)
    partial = jnp.dot(h, w3_ref[...], preferred_element_type=jnp.float32)

    @pl.when(j == 0)
    def _init():
        o_ref[...] = partial + b3_ref[...]

    @pl.when(j > 0)
    def _accum():
        o_ref[...] += partial


def _gated_mlp_kernel_scratch(x_ref, w12_ref, b12_ref, w3_ref, b3_ref, o_ref,
                              acc_ref):
    """Non-f32 output: f32 VMEM accumulator, cast once at the last hidden tile."""
    j = pl.program_id(1)
    th = w3_ref.shape[0]

    @pl.when(j == 0)
    def _init():
        acc_ref[...] = jnp.zeros_like(acc_ref)

    x = x_ref[...]
    h12 = jnp.dot(x, w12_ref[...], preferred_element_type=jnp.float32) + b12_ref[...]
    gate_pre = h12[:, :th]
    value = h12[:, th:]
    gate = gate_pre * jax.nn.sigmoid(gate_pre)
    h = (gate * value).astype(w3_ref.dtype)
    acc_ref[...] += jnp.dot(h, w3_ref[...], preferred_element_type=jnp.float32)

    @pl.when(j == pl.num_programs(1) - 1)
    def _finalize():
        o_ref[...] = (acc_ref[...] + b3_ref[...]).astype(o_ref.dtype)


# ----------------------------------------------------------------------------
# Parameter prep (call ONCE at load time) + tile / VMEM sizing helpers.
# ----------------------------------------------------------------------------
def _pick_hidden_tile(H: int, th_target: int = 512) -> int:
    """Largest divisor of H <= th_target keeping blocks lane-aligned."""
    th_target = max(1, min(th_target, H))
    for align in (128, 64, 8):
        start = th_target - th_target % align
        for t in range(start, 0, -align):
            if H % t == 0:
                return t
    return H  # tiny / odd H: single full-width hidden tile


def prepare_gated_mlp_params(w1, b1, w2, b2, w3, b3, *, th=512,
                             compute_dtype=jnp.bfloat16):
    """Fuse / reformat the Gated_MLP parameters once, outside the hot path.

    w1, w2 : (D, H)  up-projection weights, stored (in, out)
    w3     : (H, D)  down-projection weight, stored (in, out)
    b1, b2 : (1, H);  b3 : (1, D)

    W1 and W2 are interleaved per hidden tile so the up-projection is a single
    MXU matmul per grid step.  Weights are cast to `compute_dtype`; biases
    stay f32 (they are added to the f32 accumulators inside the kernel).
    """
    D, H = w1.shape
    th_eff = _pick_hidden_tile(H, th)
    nh = H // th_eff
    cd = jnp.dtype(compute_dtype if compute_dtype is not None else jnp.float32)

    w12 = jnp.concatenate(
        [w1.reshape(D, nh, th_eff), w2.reshape(D, nh, th_eff)], axis=-1
    ).reshape(D, 2 * H).astype(cd)
    b12 = jnp.concatenate(
        [b1.reshape(1, nh, th_eff), b2.reshape(1, nh, th_eff)], axis=-1
    ).reshape(1, 2 * H).astype(jnp.float32)

    # TODO(synk): on v7x, w12/w3 could be stored as fp8 (dequant scale folded
    # into the f32 epilogue) to halve weight HBM traffic; needs numerics
    # validation, so it is not enabled here.
    return dict(
        w12=w12, b12=b12,
        w3=w3.astype(cd), b3=b3.astype(jnp.float32),
        th=int(th_eff), D=int(D), H=int(H), compute_dtype=cd,
    )


def _vmem_per_step_bytes(tm, th, D, c_it, out_it, use_scratch):
    # Double-buffered BlockSpec inputs/outputs + always-live scratch.
    weights = 2 * (D * 2 * th * c_it) + 2 * (th * D * c_it)
    biases = 2 * (2 * th * 4) + 2 * (D * 4)
    rows = 2 * (tm * D * c_it) + 2 * (tm * D * out_it)
    scratch = tm * D * 4 if use_scratch else 0
    return weights + biases + rows + scratch


def _choose_row_tile(M, D, th, c_it, out_it, use_scratch, vmem_cap):
    sub = 16 if c_it == 2 else 8            # bf16 packs 16 rows / sublane group
    tm_cap = _round_up(max(M, 1), sub)
    budget = int(vmem_cap * 0.70)
    tm = None
    # Largest tile that fits; 256-multiples first (v6e/v7x MXU is 256x256).
    for cand in (1024, 768, 512, 384, 256, 128, 64, 32, 16, 8):
        if cand > tm_cap or cand % sub:
            continue
        if _vmem_per_step_bytes(cand, th, D, c_it, out_it, use_scratch) <= budget:
            tm = cand
            break
    if tm is None:
        tm = min(tm_cap, sub)
    # Keep >= 2 row tiles when M allows so the "parallel" axis can shard across
    # v7x's two TensorCores (one extra, cheap grid step on v5e/v6e).
    if _round_up(M, tm) // tm < 2:
        half = _round_up(_cdiv(tm_cap, 2), sub)
        if sub <= half < tm:
            tm = half
    return tm


# ----------------------------------------------------------------------------
# Hot-path wrapper.
# ----------------------------------------------------------------------------
def gated_mlp(x, params, *, tm=None, vmem_limit_bytes=None):
    """Fused gated-MLP forward.  `params` from prepare_gated_mlp_params()."""
    w12, b12, w3, b3 = params["w12"], params["b12"], params["w3"], params["b3"]
    th = params["th"]
    cd = params["compute_dtype"]
    D, H = params["D"], params["H"]

    orig_shape = x.shape
    assert orig_shape[-1] == D, "feature dim mismatch"
    M = 1
    for s in orig_shape[:-1]:
        M *= int(s)

    out_dtype = x.dtype
    x2d = x.reshape(M, D).astype(cd)

    use_scratch = jnp.dtype(out_dtype) != jnp.float32
    c_it = jnp.dtype(cd).itemsize
    out_it = jnp.dtype(out_dtype).itemsize
    vmem_cap = _vmem_capacity_bytes()

    if tm is None:
        tm = _choose_row_tile(M, D, th, c_it, out_it, use_scratch, vmem_cap)
    sub = 16 if c_it == 2 else 8
    tm = max(sub, _round_up(min(tm, _round_up(M, sub)), sub))

    m_pad = _round_up(M, tm)
    if m_pad != M:
        x2d = jnp.pad(x2d, ((0, m_pad - M), (0, 0)))

    nh = H // th
    grid = (m_pad // tm, nh)
    n_row_tiles = grid[0]

    if vmem_limit_bytes is None:
        need = _vmem_per_step_bytes(tm, th, D, c_it, out_it, use_scratch)
        vmem_limit_bytes = int(min(vmem_cap * 0.90,
                                   max(need * 1.25 + (4 << 20), 32 << 20)))

    nbytes = lambda a: int(a.size) * a.dtype.itemsize
    cost = pl.CostEstimate(
        flops=int(2 * m_pad * D * 2 * H + 2 * m_pad * H * D),
        transcendentals=int(m_pad * H),
        bytes_accessed=int(
            nbytes(x2d)
            + n_row_tiles * (nbytes(w12) + nbytes(b12) + nbytes(w3) + nbytes(b3))
            + m_pad * D * out_it
        ),
    )

    # NOTE: if a bundle/xprof check on v6e shows DMA-exposed gaps after raising
    # tm, add pipeline_mode=pl.Buffered(3) on the w12/w3 specs (VMEM headroom
    # exists on v6e only); omitted here since the kernel is weight-BW bound.
    in_specs = [
        pl.BlockSpec((tm, D), lambda i, j: (i, 0)),          # x row tile
        pl.BlockSpec((D, 2 * th), lambda i, j: (0, j)),      # fused W1|W2 tile
        pl.BlockSpec((1, 2 * th), lambda i, j: (0, j)),      # fused b1|b2 tile
        pl.BlockSpec((th, D), lambda i, j: (j, 0)),          # W3 tile
        pl.BlockSpec((1, D), lambda i, j: (0, 0)),           # b3
    ]
    out_spec = pl.BlockSpec((tm, D), lambda i, j: (i, 0))

    if use_scratch:
        kernel = _gated_mlp_kernel_scratch
        scratch = [pltpu.VMEM((tm, D), jnp.float32)]
    else:
        kernel = _gated_mlp_kernel_inplace
        scratch = []

    out2d = pl.pallas_call(
        kernel,
        out_shape=jax.ShapeDtypeStruct((m_pad, D), out_dtype),
        grid_spec=pltpu.PrefetchScalarGridSpec(
            num_scalar_prefetch=0,
            grid=grid,
            in_specs=in_specs,
            out_specs=out_spec,
            scratch_shapes=scratch,
        ),
        compiler_params=pltpu.CompilerParams(
            dimension_semantics=("parallel", "arbitrary"),
            vmem_limit_bytes=vmem_limit_bytes,
        ),
        cost_estimate=cost,
    )(x2d, w12, b12, w3, b3)

    # NOTE: for small D (< 128 lanes) the output store is masked; real
    # transformer widths (D >= 128) make the output naturally lane-dense.
    return out2d[:M].reshape(orig_shape)


# ----------------------------------------------------------------------------
# Self-test.
# ----------------------------------------------------------------------------
if __name__ == "__main__":
    # Small shapes consistent with the module: input_size=32, expansion_factor=4.
    batch, seq = 2, 8
    input_size, expansion = 32, 4
    hidden = input_size * expansion  # 128

    key = jax.random.PRNGKey(0)
    kx, k1, k2, k3, kb1, kb2, kb3 = jax.random.split(key, 7)

    x = jax.random.normal(kx, (batch, seq, input_size), dtype=jnp.float32)

    def init_w(k, fan_in, shape):
        bound = 1.0 / jnp.sqrt(fan_in)
        return jax.random.uniform(k, shape, jnp.float32, -bound, bound)

    # Weights stored pre-transposed: (in, out).
    w1 = init_w(k1, input_size, (input_size, hidden))
    w2 = init_w(k2, input_size, (input_size, hidden))
    w3 = init_w(k3, hidden, (hidden, input_size))
    b1 = init_w(kb1, input_size, (1, hidden))
    b2 = init_w(kb2, input_size, (1, hidden))
    b3 = init_w(kb3, hidden, (1, input_size))

    def reference(x3d):
        x2 = x3d.reshape(-1, input_size)
        h1 = x2 @ w1 + b1
        gate = h1 * jax.nn.sigmoid(h1)
        y = (gate * (x2 @ w2 + b2)) @ w3 + b3
        return y.reshape(x3d.shape)

    ref = reference(x)

    # f32 compute path: tight semantic check (f32 everywhere).
    params_f32 = prepare_gated_mlp_params(w1, b1, w2, b2, w3, b3,
                                          compute_dtype=jnp.float32)
    out_f32 = gated_mlp(x, params_f32)
    jax.block_until_ready(out_f32)
    assert out_f32.shape == x.shape and out_f32.dtype == x.dtype
    assert jnp.allclose(out_f32, ref, atol=1e-5, rtol=1e-5), "f32 mismatch vs reference"

    # Default path: bf16 weights/activations, f32 accumulation, f32 output
    # (exercises the accumulate-into-output kernel).
    params = prepare_gated_mlp_params(w1, b1, w2, b2, w3, b3)  # bf16 default
    out_bf = gated_mlp(x, params)
    jax.block_until_ready(out_bf)
    assert jnp.allclose(out_bf, ref, atol=5e-2, rtol=5e-2), "bf16-compute mismatch"

    # bf16 input/output (exercises the f32-scratch accumulator kernel).
    out_bf16_io = gated_mlp(x.astype(jnp.bfloat16), params)
    jax.block_until_ready(out_bf16_io)
    assert out_bf16_io.dtype == jnp.bfloat16
    assert jnp.allclose(out_bf16_io.astype(jnp.float32), ref, atol=7e-2, rtol=7e-2), \
        "bf16-I/O mismatch"

    print("KERNEL_OK")
</pallas_src>

<mosaic_0001>
module attributes {stable_mosaic.version = 11 : i64} {
  func.func @_gated_mlp_kernel_inplace(%arg0: i32, %arg1: i32, %arg2: memref<8x32xf32, #tpu.memory_space<vmem>>, %arg3: memref<32x256xf32, #tpu.memory_space<vmem>>, %arg4: memref<1x256xf32, #tpu.memory_space<vmem>>, %arg5: memref<128x32xf32, #tpu.memory_space<vmem>>, %arg6: memref<1x32xf32, #tpu.memory_space<vmem>>, %arg7: memref<8x32xf32, #tpu.memory_space<vmem>>) attributes {dimension_semantics = [#tpu.dimension_semantics<parallel>, #tpu.dimension_semantics<arbitrary>], iteration_bounds = array<i64: 2, 1>, scalar_prefetch = 0 : i64, scratch_operands = 0 : i64, tpu.core_type = #tpu.core_type<tc>, window_params = [{transform_indices = @transform_0, window_bounds = array<i64: 8, 32>}, {transform_indices = @transform_1, window_bounds = array<i64: 32, 256>}, {transform_indices = @transform_2, window_bounds = array<i64: 1, 256>}, {transform_indices = @transform_3, window_bounds = array<i64: 128, 32>}, {pipeline_mode = #tpu.pipeline_mode<synchronous>, transform_indices = @transform_4, window_bounds = array<i64: 1, 32>}, {transform_indices = @transform_5, window_bounds = array<i64: 8, 32>}]} {
    %c0 = arith.constant 0 : index
    %c0_0 = arith.constant 0 : index
    %0 = vector.load %arg2[%c0, %c0_0] : memref<8x32xf32, #tpu.memory_space<vmem>>, vector<8x32xf32>
    %c0_1 = arith.constant 0 : index
    %c0_2 = arith.constant 0 : index
    %1 = vector.load %arg3[%c0_1, %c0_2] : memref<32x256xf32, #tpu.memory_space<vmem>>, vector<32x256xf32>
    %cst = arith.constant dense<0.000000e+00> : vector<8x256xf32>
    %2 = tpu.matmul %0, %1, %cst {dimension_numbers = #tpu.dot_dimension_numbers<[1], [0], [0], [1], [0, 0, 1, 1], [], []>} : vector<8x32xf32>, vector<32x256xf32>, vector<8x256xf32> -> vector<8x256xf32>
    %c0_3 = arith.constant 0 : index
    %c0_4 = arith.constant 0 : index
    %3 = vector.load %arg4[%c0_3, %c0_4] : memref<1x256xf32, #tpu.memory_space<vmem>>, vector<1x256xf32>
    %4 = vector.broadcast %3 : vector<1x256xf32> to vector<8x256xf32>
    %5 = arith.addf %2, %4 : vector<8x256xf32>
    %6 = vector.extract_strided_slice %5 {offsets = [0, 0], sizes = [8, 128], strides = [1, 1]} : vector<8x256xf32> to vector<8x128xf32>
    %7 = vector.extract_strided_slice %5 {offsets = [0, 128], sizes = [8, 128], strides = [1, 1]} : vector<8x256xf32> to vector<8x128xf32>
    %8 = arith.negf %6 : vector<8x128xf32>
    %9 = math.exp %8 : vector<8x128xf32>
    %cst_5 = arith.constant 1.000000e+00 : f32
    %10 = vector.broadcast %cst_5 : f32 to vector<8x128xf32>
    %11 = arith.addf %10, %9 : vector<8x128xf32>
    %12 = arith.divf %10, %11 : vector<8x128xf32>
    %13 = arith.mulf %6, %12 : vector<8x128xf32>
    %14 = arith.mulf %13, %7 : vector<8x128xf32>
    %c0_6 = arith.constant 0 : index
    %c0_7 = arith.constant 0 : index
    %15 = vector.load %arg5[%c0_6, %c0_7] : memref<128x32xf32, #tpu.memory_space<vmem>>, vector<128x32xf32>
    %cst_8 = arith.constant dense<0.000000e+00> : vector<8x32xf32>
    %16 = tpu.matmul %14, %15, %cst_8 {dimension_numbers = #tpu.dot_dimension_numbers<[1], [0], [0], [1], [0, 0, 1, 1], [], []>} : vector<8x128xf32>, vector<128x32xf32>, vector<8x32xf32> -> vector<8x32xf32>
    %c0_i32 = arith.constant 0 : i32
    %17 = arith.cmpi eq, %arg1, %c0_i32 : i32
    %18 = arith.extui %17 : i1 to i32
    %c0_i32_9 = arith.constant 0 : i32
    %19 = arith.cmpi ne, %18, %c0_i32_9 : i32
    scf.if %19 {
      %c0_12 = arith.constant 0 : index
      %c0_13 = arith.constant 0 : index
      %23 = vector.load %arg6[%c0_12, %c0_13] : memref<1x32xf32, #tpu.memory_space<vmem>>, vector<1x32xf32>
      %24 = vector.broadcast %23 : vector<1x32xf32> to vector<8x32xf32>
      %25 = arith.addf %16, %24 : vector<8x32xf32>
      %c0_14 = arith.constant 0 : index
      %c0_15 = arith.constant 0 : index
      %26 = vector.load %arg7[%c0_14, %c0_15] : memref<8x32xf32, #tpu.memory_space<vmem>>, vector<8x32xf32>
      tpu.vector_store %arg7[%c0_14, %c0_15], %25 {strides = array<i32>} : memref<8x32xf32, #tpu.memory_space<vmem>>, vector<8x32xf32>,
    } else {
    }
    %c0_i32_10 = arith.constant 0 : i32
    %20 = arith.cmpi sgt, %arg1, %c0_i32_10 : i32
    %21 = arith.extui %20 : i1 to i32
    %c0_i32_11 = arith.constant 0 : i32
    %22 = arith.cmpi ne, %21, %c0_i32_11 : i32
    scf.if %22 {
      %c0_12 = arith.constant 0 : index
      %c0_13 = arith.constant 0 : index
      %23 = vector.load %arg7[%c0_12, %c0_13] : memref<8x32xf32, #tpu.memory_space<vmem>>, vector<8x32xf32>
      %24 = arith.addf %23, %16 : vector<8x32xf32>
      %c0_14 = arith.constant 0 : index
      %c0_15 = arith.constant 0 : index
      %25 = vector.load %arg7[%c0_14, %c0_15] : memref<8x32xf32, #tpu.memory_space<vmem>>, vector<8x32xf32>
      tpu.vector_store %arg7[%c0_14, %c0_15], %24 {strides = array<i32>} : memref<8x32xf32, #tpu.memory_space<vmem>>, vector<8x32xf32>,
    } else {
    }
    return
  }
  func.func @transform_0(%arg0: i32, %arg1: i32) -> (i32, i32) {
    %c0_i32 = arith.constant 0 : i32
    %c0_i32_0 = arith.constant 0 : i32
    return %arg0, %c0_i32 : i32, i32
  }
  func.func @transform_1(%arg0: i32, %arg1: i32) -> (i32, i32) {
    %c0_i32 = arith.constant 0 : i32
    %c0_i32_0 = arith.constant 0 : i32
    return %c0_i32, %arg1 : i32, i32
  }
  func.func @transform_2(%arg0: i32, %arg1: i32) -> (i32, i32) {
    %c0_i32 = arith.constant 0 : i32
    %c0_i32_0 = arith.constant 0 : i32
    return %c0_i32, %arg1 : i32, i32
  }
  func.func @transform_3(%arg0: i32, %arg1: i32) -> (i32, i32) {
    %c0_i32 = arith.constant 0 : i32
    %c0_i32_0 = arith.constant 0 : i32
    return %arg1, %c0_i32 : i32, i32
  }
  func.func @transform_4(%arg0: i32, %arg1: i32) -> (i32, i32) {
    %c0_i32 = arith.constant 0 : i32
    %c0_i32_0 = arith.constant 0 : i32
    %c0_i32_1 = arith.constant 0 : i32
    return %c0_i32, %c0_i32_0 : i32, i32
  }
  func.func @transform_5(%arg0: i32, %arg1: i32) -> (i32, i32) {
    %c0_i32 = arith.constant 0 : i32
    %c0_i32_0 = arith.constant 0 : i32
    return %arg0, %c0_i32 : i32, i32
  }
}

</mosaic_0001>

<bundles_post_ra>
// kernel: tpu_custom_call.1
= control target key start
LH: loop header
LB: loop body
LE: loop exit
PB: predicated region body
PF: predicated region fallthrough
CT: control target
= control target key end

     0   :  { %10 = vsyncpa [#allocation3], 0  ;;  %s918_s0 = inlined_call_operand.vmem [shape: f32[16,32], index: 0, kind: input, shape index: {}]   ;;  %s919_s1 = inlined_call_operand.vmem [shape: f32[32,256], index: 1, kind: input, shape index: {}]   ;;  %s920_s2 = inlined_call_operand.vmem [shape: f32[1,256], index: 2, kind: input, shape index: {}]   ;;  %s921_s3 = inlined_call_operand.vmem [shape: f32[128,32], index: 3, kind: input, shape index: {}]   ;;  %s922_s4 = inlined_call_operand.vmem [shape: f32[1,32], index: 4, kind: input, shape index: {}]   ;;  %s923_s5 = inlined_call_operand.hbm [shape: f32[16,32], index: 5, kind: output, shape index: {}]  }
   0x1   :  { %12 = vsyncpa [#allocation3 + $0x1], 0  ;;  %s740_s18 = smov 0   ;;  %s742_s19 = smov 0  }
   0x2   :  { %s744_s20 = smov 0   ;;  %s746_s21 = smov 0  }
   0x3   :  { %s748_s22 = smov 0   ;;  %s750_s23 = smov 0  }
   0x4 LB: > { %s553_s24 = sadd.s32 4294967295, %s708_s23   ;;  %s554_s25 = sadd.s32 4294967294, %s708_s23   ;;  %s708_s23 = sphi %s750_s23, %s18_s23   ;;  %s704_s22 = sphi %s748_s22, %s930_s22   ;;  %s700_s21 = sphi %s746_s21, %s929_s21   ;;  %s696_s20 = sphi %s744_s20, %s928_s20   ;;  %s692_s19 = sphi %s742_s19, %s927_s19   ;;  %s688_s18 = sphi %s740_s18, %s926_s18  }
   0x5   : > { %s30_s26 = sadd.s32 1, %s704_s22  ;;  %s162_s27 = sadd.s32 1, %s696_s20 }
   0x6   : > { %p32_p0 = scmp.ge.s32.totalorder %s30_s26, 2  ;;  %p172_p1 = scmp.ne.s32.totalorder %s696_s20, %s692_s19 }
   0x7   : > { %p173_p2 = scmp.eq.s32.totalorder %s553_s24, 1  ;;  %p178_p3 = scmp.ne.s32.totalorder %s692_s19, %s688_s18 }
   0x8   : > { %s932_s26 = smov (%p32_p0, %s30_s26), 0  ;;  %p179_p5 = scmp.eq.s32.totalorder %s554_s25, 1 }
   0x9   : > { %p780_p4 = por %p173_p2, %p172_p1  ;;  %s159_s29 = ssub.s32 %s704_s22, %s932_s26 }
   0xa   : > { %p560_p6 = scmp.ge.s32.totalorder %s708_s23, 1  ;;  %p160_p7 = scmp.eq.s32.totalorder %s159_s29, 0 }
   0xb   : > { %p787_p8 = por %p179_p5, %p178_p3  ;;  %p233_p9 = scmp.lt.s32.totalorder %s708_s23, 3 }
   0xc   : > { %s793_s6 = scalar_select %p160_p7, %s696_s20, %s162_s27  }
   0xd   : > { %p234_p10 = pnand %p560_p6, %p233_p9 }
   0xe   : > { %p274_p11 = scmp.lt.s32.totalorder (!%p234_p10), %s700_s21, 1  ;;  %s567_s25 = sshll.u32 (!%p234_p10), %s700_s21, 3 }
   0xf   : > { %237 = sbr.rel (%p234_p10) target bundleno = 325 (0x145), region = 40 }
  0x14   : > { %v302_v0 = vld [vmem:[%s919_s1 + $0x30] sm:$0xff]  ;;  %v300_v1 = vld [vmem:[%s919_s1 + $0x20] sm:$0xff]  ;;  %v303_v2 = vld [vmem:[%s919_s1 + $0x38] sm:$0xff]  ;;  %s275_s17 = scalar_select %p274_p11, %s700_s21, 1  ;;  %vm310_vm0 = vcmask 261120  }
  0x15   : > { %326 = vmatpush.msra.mxu0 %v302_v0  ;;  %v301_v3 = vld [vmem:[%s919_s1 + $0x28] sm:$0xff]  ;;  %v298_v4 = vld [vmem:[%s919_s1 + $0x10] sm:$0xff]  ;;  %346 = vmatpush.msra.mxu1 %v303_v2  ;;  %v299_v5 = vld [vmem:[%s919_s1 + $0x18] sm:$0xff] }
  0x16   : > { %v296_v6 = vld [vmem:[%s919_s1] sm:$0xff]  ;;  %s562_s7 = sshll.u32 %s275_s17, 3  ;;  %v297_v7 = vld [vmem:[%s919_s1 + $0x8] sm:$0xff]  ;;  %v390_v9 = vld [vmem:[%s921_s3 + $0x78] sm:$0xff]  ;;  %s271_s17 = sand.u32 1, %s692_s19  }
  0x17   : > { %327 = vmatpush.msra.mxu0 %v300_v1  ;;  %347 = vmatpush.msra.mxu1 %v301_v3  ;;  %s277_s10 = scalar_lea.vmem %s918_s0, %s562_s7  ;;  %v389_v10 = vld [vmem:[%s921_s3 + $0x70] sm:$0xff]  ;;  %v388_v11 = vld [vmem:[%s921_s3 + $0x68] sm:$0xff]  ;;  %v387_v12 = vld [vmem:[%s921_s3 + $0x60] sm:$0xff]  ;;  %s561_s24 = sshll.u32 %s271_s17, 3 }
  0x18   : > { %v295_v8 = vld [vmem:[%s277_s10] sm:$0xff]  ;;  %391 = vmatpush.msra.mxu2 %v390_v9  ;;  %v386_v13 = vld [vmem:[%s921_s3 + $0x58] sm:$0xff]  ;;  %v385_v14 = vld [vmem:[%s921_s3 + $0x50] sm:$0xff]  ;;  %s439_s7 = scalar_lea.hbm %s923_s5, %s567_s25  ;;  %s273_s10 = scalar_lea.vmem [#allocation2], %s561_s24 }
  0x19   : > { %328 = vmatpush.msra.mxu0 %v298_v4  ;;  %348 = vmatpush.msra.mxu1 %v299_v5  ;;  %v384_v15 = vld [vmem:[%s921_s3 + $0x48] sm:$0xff]  ;;  %v383_v16 = vld [vmem:[%s921_s3 + $0x40] sm:$0xff]  ;;  %v382_v17 = vld [vmem:[%s921_s3 + $0x38] sm:$0xff]  ;;  %s441_s11 = sshll.u32 %s273_s10, 4  ;;  %s443_s12 = sshll.u32 %s439_s7, 4  ;;  %s442_s11 = int_to_ptr.vmem [resolvable:$true] %s441_s11  ;;  %s444_s12 = int_to_ptr.hbm [resolvable:$true] %s443_s12 }
  0x1a   : > { %392 = vmatpush.msra.mxu2 %v389_v10  ;;  %v381_v18 = vld [vmem:[%s921_s3 + $0x30] sm:$0xff]  ;;  %v380_v19 = vld [vmem:[%s921_s3 + $0x28] sm:$0xff]  ;;  %v379_v20 = vld [vmem:[%s921_s3 + $0x20] sm:$0xff]  ;;  %s429_s13 = scalar_lea.sflag [#allocation3], %s271_s17  ;;  %s644_s21 = sshra.s32 %s444_s12, 4  ;;  %s645_s21 = int_to_ptr.hbm [resolvable:$true] %s644_s21 }
  0x1b   : > { %329 = vmatpush.msra.mxu0 %v296_v6  ;;  %349 = vmatpush.msra.mxu1 %v297_v7  ;;  %v304_v21 = vld [vmem:[%s920_s2] sm:$0x3]  ;;  %v378_v22 = vld [vmem:[%s921_s3 + $0x18] sm:$0xff]  ;;  %v377_v24 = vld [vmem:[%s921_s3 + $0x10] sm:$0xff]  ;;  %s646_s14 = scalar_lea.hbm %s645_s21, 8  ;;  %s650_s24 = scalar_lea.hbm %s923_s5, 16 }
  0x1c   : > { %563 = vmatmul.msk.f32.vlgmr.msra.gmra.mxu0 %vm310_vm0, %v295_v8  ;;  %564 = vmatmul.msk.f32.vlgmr.msra.gmra.mxu1 %vm310_vm0, %v295_v8  ;;  %v306_v23 = vperm.slane %v304_v21, 0  ;;  %v376_v25 = vld [vmem:[%s921_s3 + $0x8] sm:$0xff]  ;;  %v375_v26 = vld [vmem:[%s921_s3] sm:$0xff]  ;;  %v307_v38 = vperm.slane %v304_v21, 1  ;;  %p647_p12 = scmp.ne.s32.totalorder %s645_s21, %s646_s14  ;;  %p651_p1 = scmp.lt.s32.totalorder %s645_s21, %s923_s5 }
  0x1d   : > { %393 = vmatpush.msra.mxu2 %v388_v11  ;;  %v625_v47 = vld [vmem:[%s922_s4] ss:$0 sm:$0xff]  ;;  %p652_p2 = scmp.lt.s32.totalorder %s650_s24, %s646_s14 }
  0x1e   : > { %p648_p13 = pnand %p647_p12, %p780_p4 }
  0x1f   : > { %394 = vmatpush.msra.mxu2 %v387_v12  ;;  %p653_p3 = por %p652_p2, %p651_p1 }
  0x20   : > { %p649_p0 = pneg %p648_p13 }
  0x21   : > { %395 = vmatpush.msra.mxu2 %v386_v13 }
  0x22   : > { %p654_p5 = pnand %p653_p3, %p649_p0 }
  0x23   : > { %396 = vmatpush.msra.mxu2 %v385_v14 }
  0x25   : > { %397 = vmatpush.msra.mxu2 %v384_v15 }
  0x27   : > { %398 = vmatpush.msra.mxu2 %v383_v16 }
  0x29   : > { %399 = vmatpush.msra.mxu2 %v382_v17 }
  0x2b   : > { %400 = vmatpush.msra.mxu2 %v381_v18 }
  0x2d   : > { %401 = vmatpush.msra.mxu2 %v380_v19 }
  0x2f   : > { %402 = vmatpush.msra.mxu2 %v379_v20 }
  0x31   : > { %403 = vmatpush.msra.mxu2 %v378_v22 }
  0x33   : > { %404 = vmatpush.msra.mxu2 %v377_v24 }
  0x35   : > { %405 = vmatpush.msra.mxu2 %v376_v25 }
  0x37   : > { %406 = vmatpush.msra.mxu2 %v375_v26 }
  0x99   : > { %v331_v27 = vpop.f32.mrf.mxu0  ;;  %v351_v39 = vpop.f32.mrf.mxu1 }
  0x9a   : > { %v332_v28 = vadd.f32 %v331_v27, %v306_v23  ;;  %v352_v43 = vadd.f32 %v351_v39, %v307_v38 }
  0x9c   : > { %v565_v29 = vmul.f32 -1.442695, %v332_v28 }
  0x9e   : > { %626 = vpow2.f32 %v565_v29 }
  0xa4   : > { %v627_v30 = vpop.eup %626 }
  0xa5   : > { %v357_v31 = vadd.f32 1.0, %v627_v30 }
  0xa7   : > { %628 = vrcp.f32 %v357_v31  ;;  %v369_v35 = vand.u32 2147483648, %v357_v31  ;;  %v367_v37 = vand.u32 2147483647, %v357_v31  ;;  %vm363_vm2 = vweird.f32 %v357_v31 }
  0xa9   : > { %v370_v41 = vor.u32 1.1754944e-38, %v369_v35  ;;  %vm368_vm4 = vcmp.eq.f32.partialorder %v367_v37, 8.507059e+37 }
  0xad   : > { %v629_v32 = vpop.eup %628 }
  0xae   : > { %v359_v33 = vmul.f32 %v629_v32, %v357_v31  ;;  %vm364_vm1 = vweird.f32 %v629_v32 }
  0xaf   : > { %vm365_vm3 = vmor %vm363_vm2, %vm364_vm1 }
  0xb0   : > { %v360_v34 = vsub.f32 1.0, %v359_v33 }
  0xb2   : > { %v361_v36 = vmul.f32 %v629_v32, %v360_v34 }
  0xb4   : > { %v362_v40 = vadd.f32 %v629_v32, %v361_v36 }
  0xb6   : > { %v366_v42 = vsel %vm365_vm3, %v629_v32, %v362_v40 }
  0xb7   : > { %v371_v44 = vsel %vm368_vm4, %v370_v41, %v366_v42 }
  0xb8   : > { %v373_v45 = vmul.f32 %v371_v44, %v332_v28 }
  0xba   : > { %v374_v46 = vmul.f32 %v373_v45, %v352_v43 }
  0xbc   : > { %407 = vmatmul.f32.vlgmr.msra.gmra.mxu2 %v374_v46 }
 0x13f   : > { %v408_v48 = vpop.f32.mrf.mxu2 }
 0x140   : > { %v419_v49 = vadd.f32 %v625_v47, %v408_v48 }
 0x142   : > { %420 = vst.msk [vmem:[%s273_s10] sm:$0xff] %vm310_vm0, %v419_v49 }
 0x143   : > { %657 = shalt.err (!%p654_p5)
}
 0x144   : > { %570 = dma.vmem_to_hbm [thread:$0]  (%p780_p4), %s442_s11, 128, %s444_s12, %s429_s13  }
 0x145 PF: > { %p576_p6 = scmp.ge.s32.totalorder %s708_s23, 2  ;;  %s455_s17 = sand.u32 1, %s688_s18  }
 0x146   : > { %s456_s29 = scalar_lea.sflag [#allocation3], %s455_s17 }
 0x147   : > { %p573_p7 = pnand %p576_p6, %p787_p8 }
 0x149   : > { %p574_p9 = pneg %p573_p7 }
 0x14b   : > { %683 = dma.done.wait (%p574_p9), %s456_s29, 128  }
 0x14c   : > { %685 = vsyncadd (%p574_p9), %s456_s29, 4294967168  ;;  %s18_s23 = sadd.s32 1, %s708_s23   ;;  %s926_s18 = smov %s692_s19 }
 0x14d   : > { %p15_p10 = scmp.ge.s32.totalorder %s18_s23, 4   ;;  %s927_s19 = smov %s696_s20 }
 0x14e   : > { %s928_s20 = smov %s793_s6  ;;  %s929_s21 = smov %s704_s22 }
 0x14f   : > { %s930_s22 = smov %s932_s26  ;;  %17 = sbr.rel (!%p15_p10) target bundleno = 4 (0x4), region = 92 }
 0x154   :  { %462 = vsyncpa [#allocation3], 1 }
 0x155   :  { %464 = vsyncpa [#allocation3 + $0x1], 1 }

</bundles_post_ra>
